<compile_context>
chip_gen: v6e
topology: v6e:2x2x1
jax: 0.10.0
libtpu: 0.0.40
codegen_flags: <defaults>
</compile_context>

<pallas_src>
import jax
import jax.numpy as jnp
from jax.experimental import pallas as pl
from jax.experimental.pallas import tpu as pltpu


def _round_up(n, m):
    return ((n + m - 1) // m) * m


def _choose_batch_group(B, T, target_rows=256):
    """Fold NB batch elements into one grid step so the per-layer matmul M
    dimension is ~target_rows, while keeping NB a divisor of B."""
    nb = min(B, max(1, -(-target_rows // T)))   # min(B, ceil(target/T))
    while B % nb:
        nb -= 1
    return nb


def _fused_cnn_kernel(x_ref, w_ref, b_ref, o_ref, buf0, buf1):
    """All conv+ReLU layers for NB batch elements, activations VMEM-resident.

    x_ref : (NB, T, Cin)       raw (unpadded) input block
    w_ref : (L*K, CP, CP)      bf16 weights, one (CP, CP) slab per (layer, tap)
    b_ref : (L, 1, CP)         f32 biases (channel-padded with zeros)
    o_ref : (NB, T, CP)        lane-dense final-layer output (x dtype)
    buf0, buf1 : (NB, Tp, CP)  f32 ping-pong activation slabs (with halo rows)
    """
    NB, T, Cin = x_ref.shape
    L = b_ref.shape[0]
    CP = w_ref.shape[2]
    K = w_ref.shape[0] // L
    pad = K // 2
    Tp = T + 2 * pad

    # --- per-step (re)initialisation --------------------------------------
    # Only the halo rows (never written by the layer loop) and buf0's real
    # rows need refreshing; buf1's real rows are fully overwritten by layer 0.
    if pad > 0:
        zhalo = jnp.zeros((NB, pad, CP), dtype=buf0.dtype)
        buf0[:, pl.ds(0, pad), :] = zhalo
        buf0[:, pl.ds(pad + T, pad), :] = zhalo
        buf1[:, pl.ds(0, pad), :] = zhalo
        buf1[:, pl.ds(pad + T, pad), :] = zhalo

    # Lane-dense zero clears the stale [Cin:CP) channel tail from the previous
    # grid step (and any garbage on the very first step); then write the real
    # input channels on top.
    buf0[:, pl.ds(pad, T), :] = jnp.zeros((NB, T, CP), dtype=buf0.dtype)
    buf0[:, pl.ds(pad, T), pl.ds(0, Cin)] = x_ref[...].astype(buf0.dtype)

    # --- fused layer loop (L, K, pad are static Python ints) --------------
    bufs = (buf0, buf1)
    for l in range(L):
        src = bufs[l % 2]
        acc = None
        for k in range(K):
            # Tap k = slab shifted by k rows; bf16 operands, f32 accumulation.
            tap = src[:, pl.ds(k, T), :].astype(jnp.bfloat16)
            tap = tap.reshape(NB * T, CP)
            y = jnp.dot(tap, w_ref[l * K + k],
                        preferred_element_type=jnp.float32)     # (NB*T, CP)
            acc = y if acc is None else acc + y
        acc = jnp.maximum(acc + b_ref[l], 0.0)                   # bias + ReLU
        acc = acc.reshape(NB, T, CP)
        if l == L - 1:
            o_ref[...] = acc.astype(o_ref.dtype)                 # lane-dense
        else:
            # Write only the real rows; halo rows stay zero, which is exactly
            # the zero 'same' padding the next layer's taps must see.
            bufs[(l + 1) % 2][:, pl.ds(pad, T), :] = acc.astype(buf0.dtype)


def _pack_params(params, input_dim):
    """Pack per-layer (w:(K,Cin,Cout), b:(Cout,)) into channel-padded slabs."""
    L = len(params)
    K = params[0][0].shape[0]
    hidden = params[-1][0].shape[2]
    CP = _round_up(max(hidden, input_dim), 128)
    W = jnp.zeros((L, K, CP, CP), jnp.float32)
    Bv = jnp.zeros((L, 1, CP), jnp.float32)
    for l, (w, b) in enumerate(params):
        _, cin_l, cout_l = w.shape
        W = W.at[l, :, :cin_l, :cout_l].set(w)
        Bv = Bv.at[l, 0, :cout_l].set(b)
    W = W.reshape(L * K, CP, CP).astype(jnp.bfloat16)
    return W, Bv, CP, K, hidden


def build_cnn_encoder_forward(params, input_dim):
    """Pack weights ONCE and return a jitted forward(x) matching
    CNNEncoder.forward: (B, T, input_dim) -> (B, T, hidden_dim).

    The PyTorch permutes (B,T,C)->(B,C,T)->... are identities in this
    channels-last formulation."""
    W_all, B_all, CP, K, hidden = _pack_params(params, input_dim)
    L = len(params)
    assert K % 2 == 1, "kernel assumes odd kernel_size ('same' padding)"
    pad = K // 2

    def forward(x, W, Bv):
        B, T, Cin = x.shape
        Tp = T + 2 * pad
        NB = _choose_batch_group(B, T)
        grid = (B // NB,)

        # Explicit VMEM budget (v7x: 64 MiB physical / 32 MiB scoped default):
        # double-buffered pipeline blocks + the two f32 activation slabs.
        vmem_est = (2 * NB * T * Cin * x.dtype.itemsize          # input blocks
                    + 2 * W.size * W.dtype.itemsize              # weights
                    + 2 * Bv.size * Bv.dtype.itemsize            # bias
                    + 2 * NB * T * CP * x.dtype.itemsize         # output blocks
                    + 2 * NB * Tp * CP * 4)                      # slabs
        vmem_limit = int(min(64 * 2 ** 20, max(16 * 2 ** 20, 2 * vmem_est)))

        flops = 2 * B * T * L * K * CP * CP
        bytes_accessed = (x.size * x.dtype.itemsize
                          + W.size * W.dtype.itemsize
                          + Bv.size * Bv.dtype.itemsize
                          + B * T * CP * x.dtype.itemsize)

        out_padded = pl.pallas_call(
            _fused_cnn_kernel,
            out_shape=jax.ShapeDtypeStruct((B, T, CP), x.dtype),
            grid_spec=pltpu.PrefetchScalarGridSpec(
                num_scalar_prefetch=0,
                grid=grid,
                in_specs=[
                    pl.BlockSpec((NB, T, Cin), lambda i: (i, 0, 0)),
                    # Grid-invariant weights / bias (see TODO at top about
                    # single-buffering them).
                    pl.BlockSpec((L * K, CP, CP), lambda i: (0, 0, 0)),
                    pl.BlockSpec((L, 1, CP), lambda i: (0, 0, 0)),
                ],
                out_specs=pl.BlockSpec((NB, T, CP), lambda i: (i, 0, 0)),
                scratch_shapes=[
                    pltpu.VMEM((NB, Tp, CP), jnp.float32),
                    pltpu.VMEM((NB, Tp, CP), jnp.float32),
                ],
            ),
            compiler_params=pltpu.CompilerParams(
                dimension_semantics=("parallel",),
                vmem_limit_bytes=vmem_limit),
            cost_estimate=pl.CostEstimate(
                flops=flops, transcendentals=0,
                bytes_accessed=bytes_accessed),
        )(x, W, Bv)

        # hidden_dim is rarely a 128-multiple, so the kernel stores a
        # lane-dense CP-wide slab; the slice stays inside this jitted
        # executable (no extra eager dispatch).
        return out_padded[..., :hidden]

    fwd = jax.jit(forward)
    return lambda x: fwd(x, W_all, B_all)


def init_cnn_encoder_params(key, input_dim, hidden_dim=64, num_layers=3,
                            kernel_size=3):
    """Deterministic init mimicking nn.Conv1d shapes.

    Weights stored as (K, Cin, Cout) (PyTorch stores (Cout, Cin, K))."""
    params = []
    cin = input_dim
    for _ in range(num_layers):
        key, kw, kb = jax.random.split(key, 3)
        fan_in = cin * kernel_size
        bound = 1.0 / jnp.sqrt(fan_in)
        w = jax.random.uniform(kw, (kernel_size, cin, hidden_dim),
                               jnp.float32, -bound, bound)
        b = jax.random.uniform(kb, (hidden_dim,), jnp.float32, -bound, bound)
        params.append((w, b))
        cin = hidden_dim
    return params


def _reference_forward(x, params):
    """Pure-JAX f32 reference using lax.conv_general_dilated."""
    for w, b in params:
        w_oiw = jnp.transpose(w, (2, 1, 0))          # (Cout, Cin, K)
        x_ncw = jnp.transpose(x, (0, 2, 1))          # (B, Cin, T)
        y = jax.lax.conv_general_dilated(
            x_ncw, w_oiw, window_strides=(1,),
            padding=[(w.shape[0] // 2, w.shape[0] // 2)],
            dimension_numbers=("NCW", "OIW", "NCW"))
        y = jnp.maximum(y + b[None, :, None], 0.0)
        x = jnp.transpose(y, (0, 2, 1))              # back to (B, T, C)
    return x


if __name__ == "__main__":
    key = jax.random.PRNGKey(0)
    B, T, input_dim, hidden_dim, num_layers, kernel_size = 2, 16, 4, 32, 3, 3

    key, kx = jax.random.split(key)
    x = jax.random.normal(kx, (B, T, input_dim), dtype=jnp.float32)

    params = init_cnn_encoder_params(key, input_dim, hidden_dim,
                                     num_layers, kernel_size)

    forward = build_cnn_encoder_forward(params, input_dim)   # packs once
    out = jax.block_until_ready(forward(x))
    ref = jax.block_until_ready(_reference_forward(x, params))

    assert out.shape == (B, T, hidden_dim)
    # bf16 MXU operands with f32 accumulation -> loosened tolerance vs f32 ref.
    assert jnp.allclose(out, ref, atol=2e-2, rtol=2e-2), "mismatch vs reference"

    print("KERNEL_OK")
</pallas_src>

<mosaic_0001>
module attributes {stable_mosaic.version = 11 : i64} {
  func.func @_fused_cnn_kernel(%arg0: i32, %arg1: memref<2x16x4xf32, #tpu.memory_space<vmem>>, %arg2: memref<9x128x128xbf16, #tpu.memory_space<vmem>>, %arg3: memref<3x1x128xf32, #tpu.memory_space<vmem>>, %arg4: memref<2x16x128xf32, #tpu.memory_space<vmem>>, %arg5: memref<2x18x128xf32, #tpu.memory_space<vmem>>, %arg6: memref<2x18x128xf32, #tpu.memory_space<vmem>>) attributes {dimension_semantics = [#tpu.dimension_semantics<parallel>], iteration_bounds = array<i64: 1>, scalar_prefetch = 0 : i64, scratch_operands = 2 : i64, tpu.core_type = #tpu.core_type<tc>, window_params = [{transform_indices = @transform_0, window_bounds = array<i64: 2, 16, 4>}, {pipeline_mode = #tpu.pipeline_mode<synchronous>, transform_indices = @transform_1, window_bounds = array<i64: 9, 128, 128>}, {pipeline_mode = #tpu.pipeline_mode<synchronous>, transform_indices = @transform_2, window_bounds = array<i64: 3, 1, 128>}, {transform_indices = @transform_3, window_bounds = array<i64: 2, 16, 128>}]} {
    %cst = arith.constant 0.000000e+00 : f32
    %0 = vector.broadcast %cst : f32 to vector<2x1x128xf32>
    %c0 = arith.constant 0 : index
    %c0_0 = arith.constant 0 : index
    %c0_1 = arith.constant 0 : index
    %1 = vector.load %arg5[%c0, %c0_0, %c0_1] : memref<2x18x128xf32, #tpu.memory_space<vmem>>, vector<2x1x128xf32>
    tpu.vector_store %arg5[%c0, %c0_0, %c0_1], %0 {strides = array<i32>} : memref<2x18x128xf32, #tpu.memory_space<vmem>>, vector<2x1x128xf32>,
    %c0_2 = arith.constant 0 : index
    %c17 = arith.constant 17 : index
    %c0_3 = arith.constant 0 : index
    %2 = vector.load %arg5[%c0_2, %c17, %c0_3] : memref<2x18x128xf32, #tpu.memory_space<vmem>>, vector<2x1x128xf32>
    tpu.vector_store %arg5[%c0_2, %c17, %c0_3], %0 {strides = array<i32>} : memref<2x18x128xf32, #tpu.memory_space<vmem>>, vector<2x1x128xf32>,
    %c0_4 = arith.constant 0 : index
    %c0_5 = arith.constant 0 : index
    %c0_6 = arith.constant 0 : index
    %3 = vector.load %arg6[%c0_4, %c0_5, %c0_6] : memref<2x18x128xf32, #tpu.memory_space<vmem>>, vector<2x1x128xf32>
    tpu.vector_store %arg6[%c0_4, %c0_5, %c0_6], %0 {strides = array<i32>} : memref<2x18x128xf32, #tpu.memory_space<vmem>>, vector<2x1x128xf32>,
    %c0_7 = arith.constant 0 : index
    %c17_8 = arith.constant 17 : index
    %c0_9 = arith.constant 0 : index
    %4 = vector.load %arg6[%c0_7, %c17_8, %c0_9] : memref<2x18x128xf32, #tpu.memory_space<vmem>>, vector<2x1x128xf32>
    tpu.vector_store %arg6[%c0_7, %c17_8, %c0_9], %0 {strides = array<i32>} : memref<2x18x128xf32, #tpu.memory_space<vmem>>, vector<2x1x128xf32>,
    %cst_10 = arith.constant 0.000000e+00 : f32
    %5 = vector.broadcast %cst_10 : f32 to vector<2x16x128xf32>
    %c0_11 = arith.constant 0 : index
    %c1 = arith.constant 1 : index
    %c0_12 = arith.constant 0 : index
    %6 = vector.load %arg5[%c0_11, %c1, %c0_12] : memref<2x18x128xf32, #tpu.memory_space<vmem>>, vector<2x16x128xf32>
    tpu.vector_store %arg5[%c0_11, %c1, %c0_12], %5 {strides = array<i32>} : memref<2x18x128xf32, #tpu.memory_space<vmem>>, vector<2x16x128xf32>,
    %c0_13 = arith.constant 0 : index
    %c0_14 = arith.constant 0 : index
    %c0_15 = arith.constant 0 : index
    %7 = vector.load %arg1[%c0_13, %c0_14, %c0_15] : memref<2x16x4xf32, #tpu.memory_space<vmem>>, vector<2x16x4xf32>
    %c0_16 = arith.constant 0 : index
    %c1_17 = arith.constant 1 : index
    %c0_18 = arith.constant 0 : index
    %8 = vector.load %arg5[%c0_16, %c1_17, %c0_18] : memref<2x18x128xf32, #tpu.memory_space<vmem>>, vector<2x16x4xf32>
    tpu.vector_store %arg5[%c0_16, %c1_17, %c0_18], %7 {strides = array<i32>} : memref<2x18x128xf32, #tpu.memory_space<vmem>>, vector<2x16x4xf32>,
    %c0_19 = arith.constant 0 : index
    %c0_20 = arith.constant 0 : index
    %c0_21 = arith.constant 0 : index
    %9 = vector.load %arg5[%c0_19, %c0_20, %c0_21] : memref<2x18x128xf32, #tpu.memory_space<vmem>>, vector<2x16x128xf32>
    %10 = arith.truncf %9 : vector<2x16x128xf32> to vector<2x16x128xbf16>
    %11 = vector.shape_cast %10 : vector<2x16x128xbf16> to vector<32x128xbf16>
    %c0_22 = arith.constant 0 : index
    %c0_23 = arith.constant 0 : index
    %c0_24 = arith.constant 0 : index
    %12 = vector.load %arg2[%c0_22, %c0_23, %c0_24] : memref<9x128x128xbf16, #tpu.memory_space<vmem>>, vector<1x128x128xbf16>
    %13 = vector.shape_cast %12 : vector<1x128x128xbf16> to vector<128x128xbf16>
    %cst_25 = arith.constant dense<0.000000e+00> : vector<32x128xf32>
    %14 = tpu.matmul %11, %13, %cst_25 {dimension_numbers = #tpu.dot_dimension_numbers<[1], [0], [0], [1], [0, 0, 1, 1], [], []>} : vector<32x128xbf16>, vector<128x128xbf16>, vector<32x128xf32> -> vector<32x128xf32>
    %c0_26 = arith.constant 0 : index
    %c1_27 = arith.constant 1 : index
    %c0_28 = arith.constant 0 : index
    %15 = vector.load %arg5[%c0_26, %c1_27, %c0_28] : memref<2x18x128xf32, #tpu.memory_space<vmem>>, vector<2x16x128xf32>
    %16 = arith.truncf %15 : vector<2x16x128xf32> to vector<2x16x128xbf16>
    %17 = vector.shape_cast %16 : vector<2x16x128xbf16> to vector<32x128xbf16>
    %c1_29 = arith.constant 1 : index
    %c0_30 = arith.constant 0 : index
    %c0_31 = arith.constant 0 : index
    %18 = vector.load %arg2[%c1_29, %c0_30, %c0_31] : memref<9x128x128xbf16, #tpu.memory_space<vmem>>, vector<1x128x128xbf16>
    %19 = vector.shape_cast %18 : vector<1x128x128xbf16> to vector<128x128xbf16>
    %cst_32 = arith.constant dense<0.000000e+00> : vector<32x128xf32>
    %20 = tpu.matmul %17, %19, %cst_32 {dimension_numbers = #tpu.dot_dimension_numbers<[1], [0], [0], [1], [0, 0, 1, 1], [], []>} : vector<32x128xbf16>, vector<128x128xbf16>, vector<32x128xf32> -> vector<32x128xf32>
    %21 = arith.addf %14, %20 : vector<32x128xf32>
    %c0_33 = arith.constant 0 : index
    %c2 = arith.constant 2 : index
    %c0_34 = arith.constant 0 : index
    %22 = vector.load %arg5[%c0_33, %c2, %c0_34] : memref<2x18x128xf32, #tpu.memory_space<vmem>>, vector<2x16x128xf32>
    %23 = arith.truncf %22 : vector<2x16x128xf32> to vector<2x16x128xbf16>
    %24 = vector.shape_cast %23 : vector<2x16x128xbf16> to vector<32x128xbf16>
    %c2_35 = arith.constant 2 : index
    %c0_36 = arith.constant 0 : index
    %c0_37 = arith.constant 0 : index
    %25 = vector.load %arg2[%c2_35, %c0_36, %c0_37] : memref<9x128x128xbf16, #tpu.memory_space<vmem>>, vector<1x128x128xbf16>
    %26 = vector.shape_cast %25 : vector<1x128x128xbf16> to vector<128x128xbf16>
    %cst_38 = arith.constant dense<0.000000e+00> : vector<32x128xf32>
    %27 = tpu.matmul %24, %26, %cst_38 {dimension_numbers = #tpu.dot_dimension_numbers<[1], [0], [0], [1], [0, 0, 1, 1], [], []>} : vector<32x128xbf16>, vector<128x128xbf16>, vector<32x128xf32> -> vector<32x128xf32>
    %28 = arith.addf %21, %27 : vector<32x128xf32>
    %c0_39 = arith.constant 0 : index
    %c0_40 = arith.constant 0 : index
    %c0_41 = arith.constant 0 : index
    %29 = vector.load %arg3[%c0_39, %c0_40, %c0_41] : memref<3x1x128xf32, #tpu.memory_space<vmem>>, vector<1x1x128xf32>
    %30 = vector.shape_cast %29 : vector<1x1x128xf32> to vector<1x128xf32>
    %31 = vector.broadcast %30 : vector<1x128xf32> to vector<32x128xf32>
    %32 = arith.addf %28, %31 : vector<32x128xf32>
    %cst_42 = arith.constant 0.000000e+00 : f32
    %33 = vector.broadcast %cst_42 : f32 to vector<32x128xf32>
    %34 = arith.maximumf %32, %33 : vector<32x128xf32>
    %35 = vector.shape_cast %34 : vector<32x128xf32> to vector<2x16x128xf32>
    %c0_43 = arith.constant 0 : index
    %c1_44 = arith.constant 1 : index
    %c0_45 = arith.constant 0 : index
    %36 = vector.load %arg6[%c0_43, %c1_44, %c0_45] : memref<2x18x128xf32, #tpu.memory_space<vmem>>, vector<2x16x128xf32>
    tpu.vector_store %arg6[%c0_43, %c1_44, %c0_45], %35 {strides = array<i32>} : memref<2x18x128xf32, #tpu.memory_space<vmem>>, vector<2x16x128xf32>,
    %c0_46 = arith.constant 0 : index
    %c0_47 = arith.constant 0 : index
    %c0_48 = arith.constant 0 : index
    %37 = vector.load %arg6[%c0_46, %c0_47, %c0_48] : memref<2x18x128xf32, #tpu.memory_space<vmem>>, vector<2x16x128xf32>
    %38 = arith.truncf %37 : vector<2x16x128xf32> to vector<2x16x128xbf16>
    %39 = vector.shape_cast %38 : vector<2x16x128xbf16> to vector<32x128xbf16>
    %c3 = arith.constant 3 : index
    %c0_49 = arith.constant 0 : index
    %c0_50 = arith.constant 0 : index
    %40 = vector.load %arg2[%c3, %c0_49, %c0_50] : memref<9x128x128xbf16, #tpu.memory_space<vmem>>, vector<1x128x128xbf16>
    %41 = vector.shape_cast %40 : vector<1x128x128xbf16> to vector<128x128xbf16>
    %cst_51 = arith.constant dense<0.000000e+00> : vector<32x128xf32>
    %42 = tpu.matmul %39, %41, %cst_51 {dimension_numbers = #tpu.dot_dimension_numbers<[1], [0], [0], [1], [0, 0, 1, 1], [], []>} : vector<32x128xbf16>, vector<128x128xbf16>, vector<32x128xf32> -> vector<32x128xf32>
    %c0_52 = arith.constant 0 : index
    %c1_53 = arith.constant 1 : index
    %c0_54 = arith.constant 0 : index
    %43 = vector.load %arg6[%c0_52, %c1_53, %c0_54] : memref<2x18x128xf32, #tpu.memory_space<vmem>>, vector<2x16x128xf32>
    %44 = arith.truncf %43 : vector<2x16x128xf32> to vector<2x16x128xbf16>
    %45 = vector.shape_cast %44 : vector<2x16x128xbf16> to vector<32x128xbf16>
    %c4 = arith.constant 4 : index
    %c0_55 = arith.constant 0 : index
    %c0_56 = arith.constant 0 : index
    %46 = vector.load %arg2[%c4, %c0_55, %c0_56] : memref<9x128x128xbf16, #tpu.memory_space<vmem>>, vector<1x128x128xbf16>
    %47 = vector.shape_cast %46 : vector<1x128x128xbf16> to vector<128x128xbf16>
    %cst_57 = arith.constant dense<0.000000e+00> : vector<32x128xf32>
    %48 = tpu.matmul %45, %47, %cst_57 {dimension_numbers = #tpu.dot_dimension_numbers<[1], [0], [0], [1], [0, 0, 1, 1], [], []>} : vector<32x128xbf16>, vector<128x128xbf16>, vector<32x128xf32> -> vector<32x128xf32>
    %49 = arith.addf %42, %48 : vector<32x128xf32>
    %c0_58 = arith.constant 0 : index
    %c2_59 = arith.constant 2 : index
    %c0_60 = arith.constant 0 : index
    %50 = vector.load %arg6[%c0_58, %c2_59, %c0_60] : memref<2x18x128xf32, #tpu.memory_space<vmem>>, vector<2x16x128xf32>
    %51 = arith.truncf %50 : vector<2x16x128xf32> to vector<2x16x128xbf16>
    %52 = vector.shape_cast %51 : vector<2x16x128xbf16> to vector<32x128xbf16>
    %c5 = arith.constant 5 : index
    %c0_61 = arith.constant 0 : index
    %c0_62 = arith.constant 0 : index
    %53 = vector.load %arg2[%c5, %c0_61, %c0_62] : memref<9x128x128xbf16, #tpu.memory_space<vmem>>, vector<1x128x128xbf16>
    %54 = vector.shape_cast %53 : vector<1x128x128xbf16> to vector<128x128xbf16>
    %cst_63 = arith.constant dense<0.000000e+00> : vector<32x128xf32>
    %55 = tpu.matmul %52, %54, %cst_63 {dimension_numbers = #tpu.dot_dimension_numbers<[1], [0], [0], [1], [0, 0, 1, 1], [], []>} : vector<32x128xbf16>, vector<128x128xbf16>, vector<32x128xf32> -> vector<32x128xf32>
    %56 = arith.addf %49, %55 : vector<32x128xf32>
    %c1_64 = arith.constant 1 : index
    %c0_65 = arith.constant 0 : index
    %c0_66 = arith.constant 0 : index
    %57 = vector.load %arg3[%c1_64, %c0_65, %c0_66] : memref<3x1x128xf32, #tpu.memory_space<vmem>>, vector<1x1x128xf32>
    %58 = vector.shape_cast %57 : vector<1x1x128xf32> to vector<1x128xf32>
    %59 = vector.broadcast %58 : vector<1x128xf32> to vector<32x128xf32>
    %60 = arith.addf %56, %59 : vector<32x128xf32>
    %cst_67 = arith.constant 0.000000e+00 : f32
    %61 = vector.broadcast %cst_67 : f32 to vector<32x128xf32>
    %62 = arith.maximumf %60, %61 : vector<32x128xf32>
    %63 = vector.shape_cast %62 : vector<32x128xf32> to vector<2x16x128xf32>
    %c0_68 = arith.constant 0 : index
    %c1_69 = arith.constant 1 : index
    %c0_70 = arith.constant 0 : index
    %64 = vector.load %arg5[%c0_68, %c1_69, %c0_70] : memref<2x18x128xf32, #tpu.memory_space<vmem>>, vector<2x16x128xf32>
    tpu.vector_store %arg5[%c0_68, %c1_69, %c0_70], %63 {strides = array<i32>} : memref<2x18x128xf32, #tpu.memory_space<vmem>>, vector<2x16x128xf32>,
    %c0_71 = arith.constant 0 : index
    %c0_72 = arith.constant 0 : index
    %c0_73 = arith.constant 0 : index
    %65 = vector.load %arg5[%c0_71, %c0_72, %c0_73] : memref<2x18x128xf32, #tpu.memory_space<vmem>>, vector<2x16x128xf32>
    %66 = arith.truncf %65 : vector<2x16x128xf32> to vector<2x16x128xbf16>
    %67 = vector.shape_cast %66 : vector<2x16x128xbf16> to vector<32x128xbf16>
    %c6 = arith.constant 6 : index
    %c0_74 = arith.constant 0 : index
    %c0_75 = arith.constant 0 : index
    %68 = vector.load %arg2[%c6, %c0_74, %c0_75] : memref<9x128x128xbf16, #tpu.memory_space<vmem>>, vector<1x128x128xbf16>
    %69 = vector.shape_cast %68 : vector<1x128x128xbf16> to vector<128x128xbf16>
    %cst_76 = arith.constant dense<0.000000e+00> : vector<32x128xf32>
    %70 = tpu.matmul %67, %69, %cst_76 {dimension_numbers = #tpu.dot_dimension_numbers<[1], [0], [0], [1], [0, 0, 1, 1], [], []>} : vector<32x128xbf16>, vector<128x128xbf16>, vector<32x128xf32> -> vector<32x128xf32>
    %c0_77 = arith.constant 0 : index
    %c1_78 = arith.constant 1 : index
    %c0_79 = arith.constant 0 : index
    %71 = vector.load %arg5[%c0_77, %c1_78, %c0_79] : memref<2x18x128xf32, #tpu.memory_space<vmem>>, vector<2x16x128xf32>
    %72 = arith.truncf %71 : vector<2x16x128xf32> to vector<2x16x128xbf16>
    %73 = vector.shape_cast %72 : vector<2x16x128xbf16> to vector<32x128xbf16>
    %c7 = arith.constant 7 : index
    %c0_80 = arith.constant 0 : index
    %c0_81 = arith.constant 0 : index
    %74 = vector.load %arg2[%c7, %c0_80, %c0_81] : memref<9x128x128xbf16, #tpu.memory_space<vmem>>, vector<1x128x128xbf16>
    %75 = vector.shape_cast %74 : vector<1x128x128xbf16> to vector<128x128xbf16>
    %cst_82 = arith.constant dense<0.000000e+00> : vector<32x128xf32>
    %76 = tpu.matmul %73, %75, %cst_82 {dimension_numbers = #tpu.dot_dimension_numbers<[1], [0], [0], [1], [0, 0, 1, 1], [], []>} : vector<32x128xbf16>, vector<128x128xbf16>, vector<32x128xf32> -> vector<32x128xf32>
    %77 = arith.addf %70, %76 : vector<32x128xf32>
    %c0_83 = arith.constant 0 : index
    %c2_84 = arith.constant 2 : index
    %c0_85 = arith.constant 0 : index
    %78 = vector.load %arg5[%c0_83, %c2_84, %c0_85] : memref<2x18x128xf32, #tpu.memory_space<vmem>>, vector<2x16x128xf32>
    %79 = arith.truncf %78 : vector<2x16x128xf32> to vector<2x16x128xbf16>
    %80 = vector.shape_cast %79 : vector<2x16x128xbf16> to vector<32x128xbf16>
    %c8 = arith.constant 8 : index
    %c0_86 = arith.constant 0 : index
    %c0_87 = arith.constant 0 : index
    %81 = vector.load %arg2[%c8, %c0_86, %c0_87] : memref<9x128x128xbf16, #tpu.memory_space<vmem>>, vector<1x128x128xbf16>
    %82 = vector.shape_cast %81 : vector<1x128x128xbf16> to vector<128x128xbf16>
    %cst_88 = arith.constant dense<0.000000e+00> : vector<32x128xf32>
    %83 = tpu.matmul %80, %82, %cst_88 {dimension_numbers = #tpu.dot_dimension_numbers<[1], [0], [0], [1], [0, 0, 1, 1], [], []>} : vector<32x128xbf16>, vector<128x128xbf16>, vector<32x128xf32> -> vector<32x128xf32>
    %84 = arith.addf %77, %83 : vector<32x128xf32>
    %c2_89 = arith.constant 2 : index
    %c0_90 = arith.constant 0 : index
    %c0_91 = arith.constant 0 : index
    %85 = vector.load %arg3[%c2_89, %c0_90, %c0_91] : memref<3x1x128xf32, #tpu.memory_space<vmem>>, vector<1x1x128xf32>
    %86 = vector.shape_cast %85 : vector<1x1x128xf32> to vector<1x128xf32>
    %87 = vector.broadcast %86 : vector<1x128xf32> to vector<32x128xf32>
    %88 = arith.addf %84, %87 : vector<32x128xf32>
    %cst_92 = arith.constant 0.000000e+00 : f32
    %89 = vector.broadcast %cst_92 : f32 to vector<32x128xf32>
    %90 = arith.maximumf %88, %89 : vector<32x128xf32>
    %91 = vector.shape_cast %90 : vector<32x128xf32> to vector<2x16x128xf32>
    %c0_93 = arith.constant 0 : index
    %c0_94 = arith.constant 0 : index
    %c0_95 = arith.constant 0 : index
    %92 = vector.load %arg4[%c0_93, %c0_94, %c0_95] : memref<2x16x128xf32, #tpu.memory_space<vmem>>, vector<2x16x128xf32>
    tpu.vector_store %arg4[%c0_93, %c0_94, %c0_95], %91 {strides = array<i32>} : memref<2x16x128xf32, #tpu.memory_space<vmem>>, vector<2x16x128xf32>,
    return
  }
  func.func @transform_0(%arg0: i32) -> (i32, i32, i32) {
    %c0_i32 = arith.constant 0 : i32
    %c0_i32_0 = arith.constant 0 : i32
    %c0_i32_1 = arith.constant 0 : i32
    return %arg0, %c0_i32, %c0_i32_0 : i32, i32, i32
  }
  func.func @transform_1(%arg0: i32) -> (i32, i32, i32) {
    %c0_i32 = arith.constant 0 : i32
    %c0_i32_0 = arith.constant 0 : i32
    %c0_i32_1 = arith.constant 0 : i32
    %c0_i32_2 = arith.constant 0 : i32
    return %c0_i32, %c0_i32_0, %c0_i32_1 : i32, i32, i32
  }
  func.func @transform_2(%arg0: i32) -> (i32, i32, i32) {
    %c0_i32 = arith.constant 0 : i32
    %c0_i32_0 = arith.constant 0 : i32
    %c0_i32_1 = arith.constant 0 : i32
    %c0_i32_2 = arith.constant 0 : i32
    return %c0_i32, %c0_i32_0, %c0_i32_1 : i32, i32, i32
  }
  func.func @transform_3(%arg0: i32) -> (i32, i32, i32) {
    %c0_i32 = arith.constant 0 : i32
    %c0_i32_0 = arith.constant 0 : i32
    %c0_i32_1 = arith.constant 0 : i32
    return %arg0, %c0_i32, %c0_i32_0 : i32, i32, i32
  }
}

</mosaic_0001>

<bundles_post_ra>
// kernel: forward.1
= control target key start
LH: loop header
LB: loop body
LE: loop exit
PB: predicated region body
PF: predicated region fallthrough
CT: control target
= control target key end

     0   :  { %8 = vsyncpa [#allocation5], 0  ;;  %s1742_s0 = inlined_call_operand.vmem [shape: f32[2,16,4], index: 0, kind: input, shape index: {}]   ;;  %s1743_s1 = inlined_call_operand.hbm [shape: bf16[9,128,128], index: 1, kind: input, shape index: {}]   ;;  %s1744_s2 = inlined_call_operand.vmem [shape: f32[3,1,128], index: 2, kind: input, shape index: {}]   ;;  %s1745_s3 = inlined_call_operand.hbm [shape: f32[2,16,128], index: 3, kind: output, shape index: {}]  }
   0x1   :  { %9 = vsyncpa [#allocation6], 0  ;;  %s1688_s12 = smov [#allocation4]  }
   0x2   :  { %s17_s13 = sshll.u32 %s1688_s12, 4  ;;  %s18_s13 = int_to_ptr.vmem [resolvable:$true] %s17_s13 }
   0x3   :  { %s1652_s14 = scalar_lea.vmem %s18_s13, 9216  ;;  %p1657_p1 = scmp.lt.s32.totalorder %s18_s13, %s18_s13 }
   0x4   :  { %p1653_p0 = scmp.ne.s32.totalorder %s18_s13, %s1652_s14  ;;  %p1658_p2 = scmp.lt.s32.totalorder %s1652_s14, %s1652_s14 }
   0x6   :  { %p1659_p3 = por %p1658_p2, %p1657_p1 }
   0x8   :  { %p1660_p4 = pnand %p1659_p3, %p1653_p0 }
   0xa   :  { %1663 = shalt.err (!%p1660_p4)
}
   0xb   :  { %s1689_s15 = smov 64   ;;  %s1690_s16 = smov 4  }
   0xc   :  { %23 = dma.hbm_to_vmem [thread:$0]  %s1743_s1, 9216, %s18_s13, [#allocation5], %s1689_s15, %s1689_s15, %s1690_s16  }
   0xd   :  { %1684 = dma.done.wait [#allocation5], 9216  }
   0xe   :  { %1685 = vsyncadd [#allocation5], 4294958080  ;;  %v1691_v0 = vmov 0.0   ;;  %v1572_v1 = vld [vmem:[#allocation4 + $0x78] sm:$0xff]   ;;  %v1574_v3 = vld [vmem:[#allocation4 + $0x70] sm:$0xff]   ;;  %vm46_vm0 = vcmask 31744  }
   0xf   :  { %38 = vst [vmem:[#allocation2 + $0x1] sm:$0xff] %v1691_v0  ;;  %39 = vst [vmem:[#allocation2 + $0x9] sm:$0xff] %v1691_v0  ;;  %v1573_v2 = vld [vmem:[#allocation4 + $0x38] sm:$0xff]   ;;  %1385 = vmatprep.subr.bf16.mxu0 %v1572_v1  ;;  %v1575_v4 = vld [vmem:[#allocation4 + $0x30] sm:$0xff]   ;;  %s1692_s4 = smov [#allocation7]  }
  0x10   :  { %30 = vst [vmem:[#allocation2] sm:$0x1] %v1691_v0  ;;  %31 = vst [vmem:[#allocation2 + $0x18] sm:$0x1] %v1691_v0  ;;  %1405 = vmatprep.subr.bf16.mxu1 %v1573_v2  ;;  %1386 = vmatpush3.bf16.msra.mxu0 %v1572_v1  ;;  %v1576_v5 = vld [vmem:[#allocation4 + $0x68] sm:$0xff]   ;;  %v1578_v7 = vld [vmem:[#allocation4 + $0x60] sm:$0xff]  }
  0x11   :  { %32 = vst [vmem:[#allocation2 + $0x11] sm:$0x1] %v1691_v0  ;;  %33 = vst [vmem:[#allocation2 + $0x29] sm:$0x1] %v1691_v0  ;;  %1406 = vmatpush3.bf16.msra.mxu1 %v1573_v2  ;;  %1387 = vmatprep.subr.bf16.mxu0 %v1574_v3  ;;  %v1577_v6 = vld [vmem:[#allocation4 + $0x28] sm:$0xff]   ;;  %v1579_v8 = vld [vmem:[#allocation4 + $0x20] sm:$0xff]  }
  0x12   :  { %34 = vst [vmem:[#allocation3] sm:$0x1] %v1691_v0  ;;  %35 = vst [vmem:[#allocation3 + $0x18] sm:$0x1] %v1691_v0  ;;  %1407 = vmatprep.subr.bf16.mxu1 %v1575_v4  ;;  %v1580_v9 = vld [vmem:[#allocation4 + $0x58] sm:$0xff]   ;;  %v1582_v11 = vld [vmem:[#allocation4 + $0x50] sm:$0xff]  }
  0x13   :  { %36 = vst [vmem:[#allocation3 + $0x11] sm:$0x1] %v1691_v0  ;;  %37 = vst [vmem:[#allocation3 + $0x29] sm:$0x1] %v1691_v0  ;;  %v1581_v10 = vld [vmem:[#allocation4 + $0x18] sm:$0xff]   ;;  %v1583_v12 = vld [vmem:[#allocation4 + $0x10] sm:$0xff]  }
  0x14   :  { %40 = vst [vmem:[#allocation2 + $0x19] sm:$0xff] %v1691_v0  ;;  %41 = vst [vmem:[#allocation2 + $0x21] sm:$0xff] %v1691_v0  ;;  %1388 = vmatpush3.bf16.msra.mxu0 %v1574_v3  ;;  %v42_v13 = vld [vmem:[%s1742_s0] sm:$0xff]  ;;  %v43_v14 = vld [vmem:[%s1742_s0 + $0x8] sm:$0xff]  ;;  %s1206_s5 = sshll.u32 %s1692_s4, 4  ;;  %s1207_s5 = int_to_ptr.vmem [resolvable:$true] %s1206_s5 }
  0x15   :  { %1408 = vmatpush3.bf16.msra.mxu1 %v1575_v4  ;;  %1389 = vmatprep.subr.bf16.mxu0 %v1576_v5  ;;  %v44_v15 = vld [vmem:[%s1742_s0 + $0x10] sm:$0xff]  ;;  %47 = vst.msk [vmem:[#allocation2 + $0x1] sm:$0xff] %vm46_vm0, %v42_v13  ;;  %48 = vst.msk [vmem:[#allocation2 + $0x9] sm:$0xff] %vm46_vm0, %v43_v14  ;;  %v45_v16 = vld [vmem:[%s1742_s0 + $0x18] sm:$0xff]  ;;  %p1669_p6 = scmp.lt.s32.totalorder %s1207_s5, %s1207_s5 }
  0x16   :  { %1409 = vmatprep.subr.bf16.mxu1 %v1577_v6  ;;  %49 = vst.msk [vmem:[#allocation2 + $0x19] sm:$0xff] %vm46_vm0, %v44_v15  ;;  %50 = vst.msk [vmem:[#allocation2 + $0x21] sm:$0xff] %vm46_vm0, %v45_v16  ;;  %v1584_v17 = vld [vmem:[#allocation4 + $0x48] sm:$0xff]   ;;  %v1586_v19 = vld [vmem:[#allocation4 + $0x40] sm:$0xff]  }
  0x17   :  { %v1585_v18 = vld [vmem:[#allocation4 + $0x8] sm:$0xff]   ;;  %v1587_v23 = vld [vmem:[#allocation4] sm:$0xff]   ;;  %v1588_v28 = vld [vmem:[#allocation4 + $0xb8] sm:$0xff]  }
  0x18   :  { %1390 = vmatpush3.bf16.msra.mxu0 %v1576_v5  ;;  %v1589_v35 = vld [vmem:[#allocation4 + $0xb0] sm:$0xff]   ;;  %v1590_v38 = vld [vmem:[#allocation4 + $0xa8] sm:$0xff]   ;;  %v1591_v39 = vld [vmem:[#allocation4 + $0xa0] sm:$0xff]  }
  0x19   :  { %1410 = vmatpush3.bf16.msra.mxu1 %v1577_v6  ;;  %1391 = vmatprep.subr.bf16.mxu0 %v1578_v7  ;;  %v1592_v40 = vld [vmem:[#allocation4 + $0x98] sm:$0xff]   ;;  %v1593_v41 = vld [vmem:[#allocation4 + $0x90] sm:$0xff]   ;;  %v1594_v42 = vld [vmem:[#allocation4 + $0x88] sm:$0xff]  }
  0x1a   :  { %1411 = vmatprep.subr.bf16.mxu1 %v1579_v8  ;;  %v1595_v43 = vld [vmem:[#allocation4 + $0x80] sm:$0xff]   ;;  %v1596_v47 = vld [vmem:[#allocation4 + $0x138] sm:$0xff]   ;;  %v1598_v49 = vld [vmem:[#allocation4 + $0x130] sm:$0xff]  }
  0x1b   :  { %v1597_v48 = vld [vmem:[#allocation4 + $0xf8] sm:$0xff]   ;;  %v1599_v50 = vld [vmem:[#allocation4 + $0xf0] sm:$0xff]   ;;  %v1600_v51 = vld [vmem:[#allocation4 + $0x128] sm:$0xff]  }
  0x1c   :  { %1392 = vmatpush3.bf16.msra.mxu0 %v1578_v7  ;;  %v73_v20 = vld [vmem:[#allocation2 + $0x1] sm:$0xff]  ;;  %v74_v21 = vld [vmem:[#allocation2 + $0x9] sm:$0xff]  ;;  %v1604_v53 = vld [vmem:[#allocation4 + $0x118] sm:$0xff]  }
  0x1d   :  { %1412 = vmatpush3.bf16.msra.mxu1 %v1579_v8  ;;  %1393 = vmatprep.subr.bf16.mxu0 %v1580_v9  ;;  %v51_v22 = vld [vmem:[#allocation2] sm:$0xff]  ;;  %v77_v24 = vpack.c.bf16 %v74_v21, %v73_v20  ;;  %v52_v25 = vld [vmem:[#allocation2 + $0x8] sm:$0xff]  ;;  %v53_v30 = vld [vmem:[#allocation2 + $0x18] sm:$0xff] }
  0x1e   :  { %1413 = vmatprep.subr.bf16.mxu1 %v1581_v10  ;;  %v55_v26 = vpack.c.bf16 %v52_v25, %v51_v22  ;;  %v75_v27 = vld [vmem:[#allocation2 + $0x19] sm:$0xff]  ;;  %v76_v29 = vld [vmem:[#allocation2 + $0x21] sm:$0xff]  ;;  %v291_v33 = vld [vmem:[#allocation2 + $0xa] sm:$0xff] }
  0x1f   :  { %1401 = vmatprep.mubr.bf16.mxu0 %v77_v24  ;;  %v54_v31 = vld [vmem:[#allocation2 + $0x20] sm:$0xff]  ;;  %v78_v34 = vpack.c.bf16 %v76_v29, %v75_v27  ;;  %v1601_v54 = vld [vmem:[#allocation4 + $0xe8] sm:$0xff]   ;;  %v1606_v55 = vld [vmem:[#allocation4 + $0x110] sm:$0xff]  }
  0x20   :  { %1394 = vmatpush3.bf16.msra.mxu0 %v1580_v9  ;;  %v290_v32 = vld [vmem:[#allocation2 + $0x2] sm:$0xff]  ;;  %1421 = vmatprep.mubr.bf16.mxu1 %v55_v26  ;;  %v56_v36 = vpack.c.bf16 %v54_v31, %v53_v30  ;;  %v292_v44 = vld [vmem:[#allocation2 + $0x1a] sm:$0xff]  ;;  %v1607_v60 = vld [vmem:[#allocation4 + $0xd0] sm:$0xff]  }
  0x21   :  { %1414 = vmatpush3.bf16.msra.mxu1 %v1581_v10  ;;  %1395 = vmatprep.subr.bf16.mxu0 %v1582_v11  ;;  %v294_v37 = vpack.c.bf16 %v291_v33, %v290_v32  ;;  %v293_v45 = vld [vmem:[#allocation2 + $0x22] sm:$0xff]  ;;  %v1605_v58 = vld [vmem:[#allocation4 + $0xd8] sm:$0xff]   ;;  %v1242_v9 = vld [vmem:[%s1744_s2] ss:$0 sm:$0xff] }
  0x22   :  { %1415 = vmatprep.subr.bf16.mxu1 %v1583_v12  ;;  %v295_v46 = vpack.c.bf16 %v293_v45, %v292_v44  ;;  %v1602_v52 = vld [vmem:[#allocation4 + $0x120] sm:$0xff]   ;;  %v1608_v57 = vld [vmem:[#allocation4 + $0x108] sm:$0xff]   ;;  %v1612_v62 = vld [vmem:[#allocation4 + $0x178] sm:$0xff]  }
  0x23   :  { %v1603_v56 = vld [vmem:[#allocation4 + $0xe0] sm:$0xff]   ;;  %v1609_v61 = vld [vmem:[#allocation4 + $0xc8] sm:$0xff]   ;;  %v1613_v31 = vld [vmem:[#allocation4 + $0x170] sm:$0xff]  }
  0x24   :  { %1396 = vmatpush3.bf16.msra.mxu0 %v1582_v11  ;;  %v1610_v59 = vld [vmem:[#allocation4 + $0x100] sm:$0xff]   ;;  %v1614_v32 = vld [vmem:[#allocation4 + $0x168] sm:$0xff]   ;;  %v1617_v44 = vld [vmem:[#allocation4 + $0x150] sm:$0xff]  }
  0x25   :  { %1416 = vmatpush3.bf16.msra.mxu1 %v1583_v12  ;;  %1397 = vmatprep.subr.bf16.mxu0 %v1584_v17  ;;  %v1611_v63 = vld [vmem:[#allocation4 + $0xc0] sm:$0xff]   ;;  %v1618_v45 = vld [vmem:[#allocation4 + $0x148] sm:$0xff]  }
  0x26   :  { %1417 = vmatprep.subr.bf16.mxu1 %v1585_v18 }
  0x28   :  { %1398 = vmatpush3.bf16.msra.mxu0 %v1584_v17 }
  0x29   :  { %1418 = vmatpush3.bf16.msra.mxu1 %v1585_v18  ;;  %1399 = vmatprep.subr.bf16.mxu0 %v1586_v19 }
  0x2a   :  { %1419 = vmatprep.subr.bf16.mxu1 %v1587_v23 }
  0x2c   :  { %1400 = vmatpush3.bf16.msra.mxu0 %v1586_v19 }
  0x2d   :  { %1420 = vmatpush3.bf16.msra.mxu1 %v1587_v23  ;;  %1425 = vmatprep.subr.bf16.mxu0 %v1588_v28 }
  0x2e   :  { %1445 = vmatprep.subr.bf16.mxu1 %v1596_v47 }
  0x2f   :  { %1402 = vmatmul.mubr.bf16.vlgmr.msra.gmra.mxu0 %v78_v34 }
  0x30   :  { %1422 = vmatmul.mubr.bf16.vlgmr.msra.gmra.mxu1 %v56_v36  ;;  %1426 = vmatpush3.bf16.msra.mxu0 %v1588_v28 }
  0x31   :  { %1427 = vmatprep.subr.bf16.mxu0 %v1589_v35  ;;  %1441 = vmatprep.mubr.bf16.mxu0 %v294_v37 }
  0x32   :  { %1446 = vmatpush3.bf16.msra.mxu1 %v1596_v47 }
  0x33   :  { %1447 = vmatprep.subr.bf16.mxu1 %v1598_v49 }
  0x34   :  { %1428 = vmatpush3.bf16.msra.mxu0 %v1589_v35 }
  0x35   :  { %1429 = vmatprep.subr.bf16.mxu0 %v1590_v38 }
  0x36   :  { %1448 = vmatpush3.bf16.msra.mxu1 %v1598_v49 }
  0x37   :  { %1449 = vmatprep.subr.bf16.mxu1 %v1600_v51 }
  0x38   :  { %1430 = vmatpush3.bf16.msra.mxu0 %v1590_v38 }
  0x39   :  { %1431 = vmatprep.subr.bf16.mxu0 %v1591_v39 }
  0x3a   :  { %1450 = vmatpush3.bf16.msra.mxu1 %v1600_v51  ;;  %v1621_v51 = vld [vmem:[#allocation4 + $0x1b8] sm:$0xff]  }
  0x3b   :  { %1451 = vmatprep.subr.bf16.mxu1 %v1602_v52 }
  0x3c   :  { %1432 = vmatpush3.bf16.msra.mxu0 %v1591_v39 }
  0x3d   :  { %1433 = vmatprep.subr.bf16.mxu0 %v1592_v40 }
  0x3e   :  { %1452 = vmatpush3.bf16.msra.mxu1 %v1602_v52  ;;  %v1622_v52 = vld [vmem:[#allocation4 + $0x1f0] sm:$0xff]  }
  0x3f   :  { %1453 = vmatprep.subr.bf16.mxu1 %v1604_v53 }
  0x40   :  { %1434 = vmatpush3.bf16.msra.mxu0 %v1592_v40 }
  0x41   :  { %1435 = vmatprep.subr.bf16.mxu0 %v1593_v41 }
  0x42   :  { %1454 = vmatpush3.bf16.msra.mxu1 %v1604_v53  ;;  %v1623_v53 = vld [vmem:[#allocation4 + $0x1b0] sm:$0xff]  }
  0x43   :  { %1455 = vmatprep.subr.bf16.mxu1 %v1606_v55 }
  0x44   :  { %1436 = vmatpush3.bf16.msra.mxu0 %v1593_v41 }
  0x45   :  { %1437 = vmatprep.subr.bf16.mxu0 %v1594_v42 }
  0x46   :  { %1456 = vmatpush3.bf16.msra.mxu1 %v1606_v55  ;;  %v1626_v55 = vld [vmem:[#allocation4 + $0x1e0] sm:$0xff]  }
  0x47   :  { %1457 = vmatprep.subr.bf16.mxu1 %v1608_v57 }
  0x48   :  { %1438 = vmatpush3.bf16.msra.mxu0 %v1594_v42  ;;  %v1615_v42 = vld [vmem:[#allocation4 + $0x160] sm:$0xff]  }
  0x49   :  { %1439 = vmatprep.subr.bf16.mxu0 %v1595_v43 }
  0x4a   :  { %1458 = vmatpush3.bf16.msra.mxu1 %v1608_v57  ;;  %v1625_v57 = vld [vmem:[#allocation4 + $0x1a8] sm:$0xff]  }
  0x4b   :  { %1459 = vmatprep.subr.bf16.mxu1 %v1610_v59 }
  0x4c   :  { %1440 = vmatpush3.bf16.msra.mxu0 %v1595_v43  ;;  %v1616_v43 = vld [vmem:[#allocation4 + $0x158] sm:$0xff]  }
  0x4d   :  { %1465 = vmatprep.subr.bf16.mxu0 %v1597_v48 }
  0x4e   :  { %1460 = vmatpush3.bf16.msra.mxu1 %v1610_v59  ;;  %v1627_v59 = vld [vmem:[#allocation4 + $0x1a0] sm:$0xff]  }
  0x4f   :  { %1442 = vmatmul.mubr.bf16.vlgmr.msra.gmra.mxu0 %v295_v46  ;;  %1485 = vmatprep.subr.bf16.mxu1 %v1612_v62  ;;  %v1619_v46 = vld [vmem:[#allocation4 + $0x140] sm:$0xff]  }
  0x50   :  { %1466 = vmatpush3.bf16.msra.mxu0 %v1597_v48 }
  0x51   :  { %1467 = vmatprep.subr.bf16.mxu0 %v1599_v50 }
  0x54   :  { %1468 = vmatpush3.bf16.msra.mxu0 %v1599_v50  ;;  %v1620_v50 = vld [vmem:[#allocation4 + $0x1f8] sm:$0xff]  }
  0x55   :  { %1469 = vmatprep.subr.bf16.mxu0 %v1601_v54 }
  0x58   :  { %1470 = vmatpush3.bf16.msra.mxu0 %v1601_v54  ;;  %v1624_v54 = vld [vmem:[#allocation4 + $0x1e8] sm:$0xff]  }
  0x59   :  { %1471 = vmatprep.subr.bf16.mxu0 %v1603_v56 }
  0x5c   :  { %1472 = vmatpush3.bf16.msra.mxu0 %v1603_v56  ;;  %v1628_v56 = vld [vmem:[#allocation4 + $0x1d8] sm:$0xff]  }
  0x5d   :  { %1473 = vmatprep.subr.bf16.mxu0 %v1605_v58 }
  0x60   :  { %1474 = vmatpush3.bf16.msra.mxu0 %v1605_v58  ;;  %v1630_v58 = vld [vmem:[#allocation4 + $0x1d0] sm:$0xff]  }
  0x61   :  { %1475 = vmatprep.subr.bf16.mxu0 %v1607_v60 }
  0x64   :  { %1476 = vmatpush3.bf16.msra.mxu0 %v1607_v60  ;;  %v1632_v60 = vld [vmem:[#allocation4 + $0x1c8] sm:$0xff]  }
  0x65   :  { %1477 = vmatprep.subr.bf16.mxu0 %v1609_v61 }
  0x68   :  { %1478 = vmatpush3.bf16.msra.mxu0 %v1609_v61  ;;  %v1629_v61 = vld [vmem:[#allocation4 + $0x198] sm:$0xff]  }
  0x69   :  { %1479 = vmatprep.subr.bf16.mxu0 %v1611_v63 }
  0x6c   :  { %1480 = vmatpush3.bf16.msra.mxu0 %v1611_v63  ;;  %v1631_v63 = vld [vmem:[#allocation4 + $0x190] sm:$0xff]  }
  0x6d   :  { %1505 = vmatprep.subr.bf16.mxu0 %v1620_v50 }
  0xef   :  { %v1403_v0 = vpop.f32.mrf.mxu0 }
  0xf0   :  { %v1423_v1 = vpop.f32.mrf.mxu1 }
  0xf1   :  { %v178_v2 = vpop.f32.mrf.mxu0  ;;  %v284_v7 = vadd.f32 %v1423_v1, %v1403_v0  ;;  %v1633_v0 = vld [vmem:[#allocation4 + $0x188] sm:$0xff]   ;;  %v1636_v1 = vld [vmem:[#allocation4 + $0x238] sm:$0xff]  }
  0xf2   :  { %v275_v3 = vpop.f32.mrf.mxu1 }
  0xf3   :  { %v1404_v4 = vpop.f32.mrf.mxu0  ;;  %v276_v10 = vadd.f32 %v275_v3, %v178_v2  ;;  %v1635_v2 = vld [vmem:[#allocation4 + $0x180] sm:$0xff]  }
  0xf4   :  { %v1424_v5 = vpop.f32.mrf.mxu1 }
  0xf5   :  { %v181_v6 = vpop.f32.mrf.mxu0  ;;  %v287_v14 = vadd.f32 %v1424_v5, %v1404_v4 }
  0xf6   :  { %v278_v12 = vpop.f32.mrf.mxu1 }
  0xf7   :  { %v279_v18 = vadd.f32 %v278_v12, %v181_v6  ;;  %v1268_v12 = vld [vmem:[%s1744_s2 + $0x1] ss:$0 sm:$0xff] }
 0x10f   :  { %v1443_v8 = vpop.f32.mrf.mxu0 }
 0x110   :  { %v412_v11 = vadd.f32 %v1443_v8, %v284_v7 }
 0x111   :  { %v395_v13 = vpop.f32.mrf.mxu0 }
 0x112   :  { %v423_v15 = vadd.f32 %v1242_v9, %v412_v11  ;;  %v410_v16 = vadd.f32 %v395_v13, %v276_v10 }
 0x113   :  { %v1444_v17 = vpop.f32.mrf.mxu0 }
 0x114   :  { %v427_v19 = vmax.f32 %v423_v15, 0.0  ;;  %v421_v20 = vadd.f32 %v1242_v9, %v410_v16  ;;  %v413_v21 = vadd.f32 %v1444_v17, %v287_v14 }
 0x115   :  { %v398_v22 = vpop.f32.mrf.mxu0 }
 0x116   :  { %431 = vst [vmem:[#allocation3 + $0x19] sm:$0xff] %v427_v19  ;;  %v425_v23 = vmax.f32 %v421_v20, 0.0  ;;  %v424_v24 = vadd.f32 %v1242_v9, %v413_v21  ;;  %v411_v25 = vadd.f32 %v398_v22, %v279_v18 }
 0x118   :  { %429 = vst [vmem:[#allocation3 + $0x1] sm:$0xff] %v425_v23  ;;  %v428_v26 = vmax.f32 %v424_v24, 0.0  ;;  %v422_v27 = vadd.f32 %v1242_v9, %v411_v25 }
 0x11a   :  { %432 = vst [vmem:[#allocation3 + $0x21] sm:$0xff] %v428_v26  ;;  %v426_v28 = vmax.f32 %v422_v27, 0.0  ;;  %v461_v30 = vpack.c.bf16 %v428_v26, %v427_v19 }
 0x11c   :  { %430 = vst [vmem:[#allocation3 + $0x9] sm:$0xff] %v426_v28  ;;  %v460_v29 = vpack.c.bf16 %v426_v28, %v425_v23 }
 0x11d   :  { %v435_v39 = vld [vmem:[#allocation3 + $0x18] sm:$0xff] }
 0x11e   :  { %1461 = vmatprep.mubr.bf16.mxu1 %v460_v29 }
 0x11f   :  { %1462 = vmatmul.mubr.bf16.vlgmr.msra.gmra.mxu1 %v461_v30  ;;  %v433_v33 = vld [vmem:[#allocation3] sm:$0xff] }
 0x120   :  { %1486 = vmatpush3.bf16.msra.mxu1 %v1612_v62  ;;  %v1634_v62 = vld [vmem:[#allocation4 + $0x1c0] sm:$0xff]  }
 0x121   :  { %1487 = vmatprep.subr.bf16.mxu1 %v1613_v31  ;;  %v436_v34 = vld [vmem:[#allocation3 + $0x20] sm:$0xff] }
 0x122   :  { %v438_v41 = vpack.c.bf16 %v436_v34, %v435_v39  ;;  %v675_v47 = vld [vmem:[#allocation3 + $0x1a] sm:$0xff]  ;;  %v676_v48 = vld [vmem:[#allocation3 + $0x22] sm:$0xff] }
 0x123   :  { %v434_v35 = vld [vmem:[#allocation3 + $0x8] sm:$0xff]  ;;  %v678_v49 = vpack.c.bf16 %v676_v48, %v675_v47  ;;  %v1637_v34 = vld [vmem:[#allocation4 + $0x230] sm:$0xff]   ;;  %v1642_v48 = vld [vmem:[#allocation4 + $0x208] sm:$0xff]  }
 0x124   :  { %v673_v36 = vld [vmem:[#allocation3 + $0x2] sm:$0xff]  ;;  %v674_v37 = vld [vmem:[#allocation3 + $0xa] sm:$0xff]  ;;  %v437_v38 = vpack.c.bf16 %v434_v35, %v433_v33  ;;  %1488 = vmatpush3.bf16.msra.mxu1 %v1613_v31  ;;  %v1638_v35 = vld [vmem:[#allocation4 + $0x228] sm:$0xff]  }
 0x125   :  { %v677_v40 = vpack.c.bf16 %v674_v37, %v673_v36  ;;  %1489 = vmatprep.subr.bf16.mxu1 %v1614_v32  ;;  %v1641_v47 = vld [vmem:[#allocation4 + $0x210] sm:$0xff]  }
 0x126   :  { %1481 = vmatprep.mubr.bf16.mxu0 %v437_v38 }
 0x127   :  { %1501 = vmatprep.mubr.bf16.mxu1 %v677_v40  ;;  %1482 = vmatmul.mubr.bf16.vlgmr.msra.gmra.mxu0 %v438_v41 }
 0x128   :  { %1490 = vmatpush3.bf16.msra.mxu1 %v1614_v32  ;;  %1506 = vmatpush3.bf16.msra.mxu0 %v1620_v50 }
 0x129   :  { %1491 = vmatprep.subr.bf16.mxu1 %v1615_v42  ;;  %1507 = vmatprep.subr.bf16.mxu0 %v1622_v52 }
 0x12c   :  { %1492 = vmatpush3.bf16.msra.mxu1 %v1615_v42  ;;  %1508 = vmatpush3.bf16.msra.mxu0 %v1622_v52 }
 0x12d   :  { %1493 = vmatprep.subr.bf16.mxu1 %v1616_v43  ;;  %1509 = vmatprep.subr.bf16.mxu0 %v1624_v54 }
 0x130   :  { %1494 = vmatpush3.bf16.msra.mxu1 %v1616_v43  ;;  %1510 = vmatpush3.bf16.msra.mxu0 %v1624_v54 }
 0x131   :  { %1495 = vmatprep.subr.bf16.mxu1 %v1617_v44  ;;  %1511 = vmatprep.subr.bf16.mxu0 %v1626_v55 }
 0x134   :  { %1496 = vmatpush3.bf16.msra.mxu1 %v1617_v44  ;;  %1512 = vmatpush3.bf16.msra.mxu0 %v1626_v55 }
 0x135   :  { %1497 = vmatprep.subr.bf16.mxu1 %v1618_v45  ;;  %1513 = vmatprep.subr.bf16.mxu0 %v1628_v56 }
 0x138   :  { %1498 = vmatpush3.bf16.msra.mxu1 %v1618_v45  ;;  %1514 = vmatpush3.bf16.msra.mxu0 %v1628_v56  ;;  %v1639_v45 = vld [vmem:[#allocation4 + $0x220] sm:$0xff]  }
 0x139   :  { %1499 = vmatprep.subr.bf16.mxu1 %v1619_v46  ;;  %1515 = vmatprep.subr.bf16.mxu0 %v1630_v58 }
 0x13c   :  { %1500 = vmatpush3.bf16.msra.mxu1 %v1619_v46  ;;  %1516 = vmatpush3.bf16.msra.mxu0 %v1630_v58  ;;  %v1640_v46 = vld [vmem:[#allocation4 + $0x218] sm:$0xff]  }
 0x13d   :  { %1525 = vmatprep.subr.bf16.mxu1 %v1621_v51  ;;  %1517 = vmatprep.subr.bf16.mxu0 %v1632_v60 }
 0x13f   :  { %1502 = vmatmul.mubr.bf16.vlgmr.msra.gmra.mxu1 %v678_v49  ;;  %v1643_v49 = vld [vmem:[#allocation4 + $0x200] sm:$0xff]  }
 0x140   :  { %1526 = vmatpush3.bf16.msra.mxu1 %v1621_v51  ;;  %1518 = vmatpush3.bf16.msra.mxu0 %v1632_v60 }
 0x141   :  { %1527 = vmatprep.subr.bf16.mxu1 %v1623_v53  ;;  %1519 = vmatprep.subr.bf16.mxu0 %v1634_v62 }
 0x144   :  { %1528 = vmatpush3.bf16.msra.mxu1 %v1623_v53  ;;  %1520 = vmatpush3.bf16.msra.mxu0 %v1634_v62  ;;  %v1294_v62 = vld [vmem:[%s1744_s2 + $0x2] ss:$0 sm:$0xff]  ;;  %s1664_s2 = scalar_lea.vmem %s1207_s5, 512 }
 0x145   :  { %1529 = vmatprep.subr.bf16.mxu1 %v1625_v57  ;;  %1545 = vmatprep.subr.bf16.mxu0 %v1636_v1  ;;  %p1665_p5 = scmp.ne.s32.totalorder %s1207_s5, %s1664_s2  ;;  %p1670_p7 = scmp.lt.s32.totalorder %s1664_s2, %s1664_s2 }
 0x147   :  { %p1671_p8 = por %p1670_p7, %p1669_p6 }
 0x148   :  { %1530 = vmatpush3.bf16.msra.mxu1 %v1625_v57 }
 0x149   :  { %1531 = vmatprep.subr.bf16.mxu1 %v1627_v59  ;;  %p1672_p9 = pnand %p1671_p8, %p1665_p5 }
 0x14c   :  { %1532 = vmatpush3.bf16.msra.mxu1 %v1627_v59 }
 0x14d   :  { %1533 = vmatprep.subr.bf16.mxu1 %v1629_v61 }
 0x150   :  { %1534 = vmatpush3.bf16.msra.mxu1 %v1629_v61 }
 0x151   :  { %1535 = vmatprep.subr.bf16.mxu1 %v1631_v63 }
 0x154   :  { %1536 = vmatpush3.bf16.msra.mxu1 %v1631_v63 }
 0x155   :  { %1537 = vmatprep.subr.bf16.mxu1 %v1633_v0 }
 0x158   :  { %1538 = vmatpush3.bf16.msra.mxu1 %v1633_v0 }
 0x159   :  { %1539 = vmatprep.subr.bf16.mxu1 %v1635_v2 }
 0x15c   :  { %1540 = vmatpush3.bf16.msra.mxu1 %v1635_v2 }
 0x1df   :  { %v1463_v3 = vpop.f32.mrf.mxu1 }
 0x1e1   :  { %v561_v5 = vpop.f32.mrf.mxu1 }
 0x1e3   :  { %v1464_v7 = vpop.f32.mrf.mxu1 }
 0x1e5   :  { %v564_v9 = vpop.f32.mrf.mxu1 }
 0x1e7   :  { %v1483_v4 = vpop.f32.mrf.mxu0 }
 0x1e8   :  { %v667_v10 = vadd.f32 %v1483_v4, %v1463_v3 }
 0x1e9   :  { %v658_v6 = vpop.f32.mrf.mxu0 }
 0x1ea   :  { %v659_v13 = vadd.f32 %v658_v6, %v561_v5 }
 0x1eb   :  { %v1484_v8 = vpop.f32.mrf.mxu0 }
 0x1ec   :  { %v670_v17 = vadd.f32 %v1484_v8, %v1464_v7 }
 0x1ed   :  { %v661_v15 = vpop.f32.mrf.mxu0 }
 0x1ee   :  { %v662_v21 = vadd.f32 %v661_v15, %v564_v9 }
 0x1ff   :  { %v1503_v11 = vpop.f32.mrf.mxu1 }
 0x200   :  { %v795_v14 = vadd.f32 %v1503_v11, %v667_v10 }
 0x201   :  { %v778_v16 = vpop.f32.mrf.mxu1 }
 0x202   :  { %v807_v18 = vadd.f32 %v1268_v12, %v795_v14  ;;  %v793_v19 = vadd.f32 %v778_v16, %v659_v13 }
 0x203   :  { %v1504_v20 = vpop.f32.mrf.mxu1 }
 0x204   :  { %v811_v22 = vmax.f32 %v807_v18, 0.0  ;;  %v805_v23 = vadd.f32 %v1268_v12, %v793_v19  ;;  %v796_v24 = vadd.f32 %v1504_v20, %v670_v17 }
 0x205   :  { %v781_v25 = vpop.f32.mrf.mxu1 }
 0x206   :  { %815 = vst [vmem:[#allocation2 + $0x19] sm:$0xff] %v811_v22  ;;  %v809_v26 = vmax.f32 %v805_v23, 0.0  ;;  %v808_v27 = vadd.f32 %v1268_v12, %v796_v24  ;;  %v794_v28 = vadd.f32 %v781_v25, %v662_v21 }
 0x208   :  { %813 = vst [vmem:[#allocation2 + $0x1] sm:$0xff] %v809_v26  ;;  %v812_v29 = vmax.f32 %v808_v27, 0.0  ;;  %v806_v30 = vadd.f32 %v1268_v12, %v794_v28 }
 0x20a   :  { %816 = vst [vmem:[#allocation2 + $0x21] sm:$0xff] %v812_v29  ;;  %v810_v31 = vmax.f32 %v806_v30, 0.0  ;;  %v845_v33 = vpack.c.bf16 %v812_v29, %v811_v22 }
 0x20c   :  { %814 = vst [vmem:[#allocation2 + $0x9] sm:$0xff] %v810_v31  ;;  %v844_v32 = vpack.c.bf16 %v810_v31, %v809_v26 }
 0x20d   :  { %v819_v42 = vld [vmem:[#allocation2 + $0x18] sm:$0xff] }
 0x20e   :  { %1521 = vmatprep.mubr.bf16.mxu0 %v844_v32 }
 0x20f   :  { %1522 = vmatmul.mubr.bf16.vlgmr.msra.gmra.mxu0 %v845_v33  ;;  %v817_v36 = vld [vmem:[#allocation2] sm:$0xff] }
 0x210   :  { %1546 = vmatpush3.bf16.msra.mxu0 %v1636_v1 }
 0x211   :  { %1547 = vmatprep.subr.bf16.mxu0 %v1637_v34  ;;  %v820_v37 = vld [vmem:[#allocation2 + $0x20] sm:$0xff] }
 0x212   :  { %v822_v44 = vpack.c.bf16 %v820_v37, %v819_v42  ;;  %v1059_v50 = vld [vmem:[#allocation2 + $0x1a] sm:$0xff]  ;;  %v1060_v51 = vld [vmem:[#allocation2 + $0x22] sm:$0xff] }
 0x213   :  { %v818_v38 = vld [vmem:[#allocation2 + $0x8] sm:$0xff]  ;;  %v1062_v52 = vpack.c.bf16 %v1060_v51, %v1059_v50 }
 0x214   :  { %v1057_v39 = vld [vmem:[#allocation2 + $0x2] sm:$0xff]  ;;  %v1058_v40 = vld [vmem:[#allocation2 + $0xa] sm:$0xff]  ;;  %v821_v41 = vpack.c.bf16 %v818_v38, %v817_v36  ;;  %1548 = vmatpush3.bf16.msra.mxu0 %v1637_v34 }
 0x215   :  { %v1061_v43 = vpack.c.bf16 %v1058_v40, %v1057_v39  ;;  %1549 = vmatprep.subr.bf16.mxu0 %v1638_v35 }
 0x216   :  { %1541 = vmatprep.mubr.bf16.mxu1 %v821_v41 }
 0x217   :  { %1561 = vmatprep.mubr.bf16.mxu0 %v1061_v43  ;;  %1542 = vmatmul.mubr.bf16.vlgmr.msra.gmra.mxu1 %v822_v44 }
 0x218   :  { %1550 = vmatpush3.bf16.msra.mxu0 %v1638_v35 }
 0x219   :  { %1551 = vmatprep.subr.bf16.mxu0 %v1639_v45 }
 0x21c   :  { %1552 = vmatpush3.bf16.msra.mxu0 %v1639_v45 }
 0x21d   :  { %1553 = vmatprep.subr.bf16.mxu0 %v1640_v46 }
 0x220   :  { %1554 = vmatpush3.bf16.msra.mxu0 %v1640_v46 }
 0x221   :  { %1555 = vmatprep.subr.bf16.mxu0 %v1641_v47 }
 0x224   :  { %1556 = vmatpush3.bf16.msra.mxu0 %v1641_v47 }
 0x225   :  { %1557 = vmatprep.subr.bf16.mxu0 %v1642_v48 }
 0x228   :  { %1558 = vmatpush3.bf16.msra.mxu0 %v1642_v48 }
 0x229   :  { %1559 = vmatprep.subr.bf16.mxu0 %v1643_v49 }
 0x22c   :  { %1560 = vmatpush3.bf16.msra.mxu0 %v1643_v49 }
 0x22f   :  { %1562 = vmatmul.mubr.bf16.vlgmr.msra.gmra.mxu0 %v1062_v52 }
 0x2cf   :  { %v1523_v53 = vpop.f32.mrf.mxu0 }
 0x2d1   :  { %v945_v55 = vpop.f32.mrf.mxu0 }
 0x2d3   :  { %v1524_v57 = vpop.f32.mrf.mxu0 }
 0x2d5   :  { %v948_v59 = vpop.f32.mrf.mxu0 }
 0x2d7   :  { %v1543_v54 = vpop.f32.mrf.mxu1 }
 0x2d8   :  { %v1051_v60 = vadd.f32 %v1543_v54, %v1523_v53 }
 0x2d9   :  { %v1042_v56 = vpop.f32.mrf.mxu1 }
 0x2da   :  { %v1043_v63 = vadd.f32 %v1042_v56, %v945_v55 }
 0x2db   :  { %v1544_v58 = vpop.f32.mrf.mxu1 }
 0x2dc   :  { %v1054_v3 = vadd.f32 %v1544_v58, %v1524_v57 }
 0x2dd   :  { %v1045_v1 = vpop.f32.mrf.mxu1 }
 0x2de   :  { %v1046_v7 = vadd.f32 %v1045_v1, %v948_v59 }
 0x2ef   :  { %v1563_v61 = vpop.f32.mrf.mxu0 }
 0x2f0   :  { %v1179_v0 = vadd.f32 %v1563_v61, %v1051_v60 }
 0x2f1   :  { %v1162_v2 = vpop.f32.mrf.mxu0 }
 0x2f2   :  { %v1191_v4 = vadd.f32 %v1294_v62, %v1179_v0  ;;  %v1177_v5 = vadd.f32 %v1162_v2, %v1043_v63 }
 0x2f3   :  { %v1564_v6 = vpop.f32.mrf.mxu0 }
 0x2f4   :  { %v1195_v8 = vmax.f32 %v1191_v4, 0.0  ;;  %v1189_v9 = vadd.f32 %v1294_v62, %v1177_v5  ;;  %v1180_v10 = vadd.f32 %v1564_v6, %v1054_v3 }
 0x2f5   :  { %v1165_v11 = vpop.f32.mrf.mxu0 }
 0x2f6   :  { %1199 = vst [vmem:[#allocation7 + $0x10] sm:$0xff] %v1195_v8  ;;  %v1193_v12 = vmax.f32 %v1189_v9, 0.0  ;;  %v1192_v13 = vadd.f32 %v1294_v62, %v1180_v10  ;;  %v1178_v14 = vadd.f32 %v1165_v11, %v1046_v7 }
 0x2f8   :  { %1197 = vst [vmem:[#allocation7] sm:$0xff] %v1193_v12  ;;  %v1196_v15 = vmax.f32 %v1192_v13, 0.0  ;;  %v1190_v16 = vadd.f32 %v1294_v62, %v1178_v14 }
 0x2fa   :  { %1200 = vst [vmem:[#allocation7 + $0x18] sm:$0xff] %v1196_v15  ;;  %v1194_v17 = vmax.f32 %v1190_v16, 0.0 }
 0x2fc   :  { %1198 = vst [vmem:[#allocation7 + $0x8] sm:$0xff] %v1194_v17 }
 0x2fd   :  { %1675 = shalt.err (!%p1672_p9)
}
 0x2fe   :  { %s1693_s6 = smov 128   ;;  %s1694_s7 = smov 8  }
 0x2ff   :  { %1212 = dma.vmem_to_hbm [thread:$0]  %s1207_s5, 512, %s1745_s3, [#allocation6], %s1693_s6, %s1693_s6, %s1694_s7  }
 0x300   :  { %1686 = dma.done.wait [#allocation6], 512  }
 0x301   :  { %1687 = vsyncadd [#allocation6], 4294966784 }
 0x302   :  { %1216 = vsyncpa [#allocation5], 1 }
 0x303   :  { %1217 = vsyncpa [#allocation6], 1 }

</bundles_post_ra>
